<compile_context>
chip_gen: v7x
topology: tpu7x:2x2x1
jax: 0.10.0
libtpu: 0.0.40
codegen_flags: <defaults>
</compile_context>

<pallas_src>
import math

import jax
import jax.numpy as jnp
from jax import lax
from jax.experimental import pallas as pl
from jax.experimental.pallas import tpu as pltpu

NEG_INF_FILL = -1000000000.0


def _softmax_last(x):
    """Numerically stable softmax along the last axis, exact normalization."""
    m = jnp.max(x, axis=-1, keepdims=True)
    e = jnp.exp(x - m)
    return e / jnp.sum(e, axis=-1, keepdims=True)


def _self_attn_kernel(xq_ref, wq_ref, k_ref, v_ref, r_ref, attn_ref, pad_ref,
                      o_ref):
    mxu_dtype = xq_ref.dtype  # feed the MXU in the input dtype (bf16-friendly)

    xq = xq_ref[0]            # (TQ, F) query-tile rows
    wq = wq_ref[...]          # (F,  O) pre-transposed, pre-scaled by 1/sqrt(F)
    k = k_ref[0]              # (S,  O) precomputed key projection
    v = v_ref[0]              # (S,  O) precomputed value projection

    # Tile-local Q projection on the MXU, f32 accumulation, already scaled.
    q = jnp.dot(xq, wq, preferred_element_type=jnp.float32)       # (TQ, O)

    # scores = (Q / sqrt(F)) @ K^T without materializing K^T: contract last axes.
    scores = lax.dot_general(
        q.astype(mxu_dtype), k,
        (((1,), (1,)), ((), ())),
        preferred_element_type=jnp.float32)                       # (TQ, S)

    # One combined mask for both masked_fill sites.
    masked = jnp.logical_or(pad_ref[0] == 0,
                            attn_ref[...].astype(jnp.int32) == 0)  # (TQ, S) bool

    r = r_ref[0].astype(jnp.float32)                               # (TQ, S)
    # NOTE: on v6e/v7x the r-bias exp could run in bf16 for EUP throughput;
    # kept f32 here to preserve reference-level accuracy.
    r_bias = _softmax_last(jnp.where(masked, NEG_INF_FILL, r))
    scores = jnp.where(masked, NEG_INF_FILL, scores + r_bias)
    prob = _softmax_last(scores)
    # Dropout: eval-mode / p == 0 -> identity (see TODO above).

    ctx = jnp.dot(prob.astype(mxu_dtype), v,
                  preferred_element_type=jnp.float32)              # (TQ, O)
    o_ref[0] = ctx.astype(o_ref.dtype)


def _tpu_generation():
    """Best-effort TPU generation from the device kind string."""
    try:
        kind = jax.devices()[0].device_kind.lower()
    except Exception:  # pragma: no cover
        kind = ""
    if "v7" in kind:
        return 7
    if "v6" in kind:
        return 6
    if "v5" in kind:
        return 5
    return 6


def _choose_tq(S, F, O, x_dtype, r_dtype, pad_dtype, tq_max, vmem_budget_bytes):
    """Largest well-aligned query-tile size that fits the per-generation VMEM budget."""
    def nbytes(dt):
        return jnp.dtype(dt).itemsize

    # Per query row (bytes): double-buffered r / pad / int8 attn streams plus
    # ~6 (TQ,S) f32 temporaries (scores, fills, exps, probs, mask) plus the
    # double-buffered (TQ,F) x tile and small (TQ,O) f32 temporaries.
    per_row = (S * (2 * nbytes(r_dtype) + 2 * nbytes(pad_dtype) + 2 * 1 + 6 * 4)
               + 2 * F * nbytes(x_dtype) + 2 * O * 4)
    # Grid-constant-ish blocks: double-buffered K/V (per batch) and the weight.
    fixed = 4 * S * O * nbytes(x_dtype) + 2 * F * O * nbytes(x_dtype)
    usable = int(0.7 * vmem_budget_bytes) - fixed
    cap = min(tq_max, S, max(8, usable // max(per_row, 1)))
    if cap >= S:
        return S
    # Prefer 128-multiples (full MXU M dim), then 64/32/16/8 (bf16 sublane packing).
    for align in (128, 64, 32, 16, 8):
        candidates = [t for t in range(align, cap + 1, align) if S % t == 0]
        if candidates:
            return max(candidates)
    # No aligned divisor fits the budget; fall back to a single tile.
    # TODO(synk): ragged last query tile for awkward S.
    return S


def self_attention_block(x, wq, wk, wv, r_mat, attn_mask, pad_mask,
                         *, tq_max=None, vmem_limit_bytes=None):
    """x: (B,S,F); wq/wk/wv: PyTorch-style (O,F); r_mat/pad_mask: (B,S,S); attn_mask: (S,S)."""
    B, S, F = x.shape
    O = wq.shape[0]
    scale = math.sqrt(F)

    gen = _tpu_generation()
    if tq_max is None:
        tq_max = 256 if gen >= 7 else 512
    if vmem_limit_bytes is None:
        # Leave headroom below physical VMEM (64 MiB/TC on v7x, 128 MiB on v5e/v6e).
        vmem_limit_bytes = (48 if gen >= 7 else 96) * 1024 * 1024

    # --- One-time host-side prep (XLA) -------------------------------------
    # Pre-transpose weights; fold 1/sqrt(F) into Wq.
    wq_t = (jnp.asarray(wq).T / scale).astype(x.dtype)                      # (F, O)
    wkv_t = jnp.concatenate([jnp.asarray(wk).T, jnp.asarray(wv).T],
                            axis=1).astype(x.dtype)                         # (F, 2O)
    # Hoisted K/V projection: one fused matmul over the whole batch, computed
    # once (not once per query tile inside the kernel).
    kv = jnp.einsum("bsf,fo->bso", x, wkv_t)                                # (B, S, 2O)
    k = kv[..., :O].astype(x.dtype)                                         # (B, S, O)
    v = kv[..., O:].astype(x.dtype)                                         # (B, S, O)
    # attn_mask is re-read once per batch -> convert to int8 once (4x less HBM).
    attn_i8 = (jnp.asarray(attn_mask) != 0).astype(jnp.int8)                # (S, S)

    tq = _choose_tq(S, F, O, x.dtype, r_mat.dtype, pad_mask.dtype,
                    tq_max, vmem_limit_bytes)
    grid = (B, S // tq)

    return pl.pallas_call(
        _self_attn_kernel,
        out_shape=jax.ShapeDtypeStruct((B, S, O), x.dtype),
        grid_spec=pltpu.PrefetchScalarGridSpec(
            num_scalar_prefetch=0,
            grid=grid,
            in_specs=[
                pl.BlockSpec((1, tq, F), lambda b, qt: (b, qt, 0)),   # x (query tile)
                pl.BlockSpec((F, O), lambda b, qt: (0, 0)),           # Wq^T / sqrt(F)
                pl.BlockSpec((1, S, O), lambda b, qt: (b, 0, 0)),     # K (per batch)
                pl.BlockSpec((1, S, O), lambda b, qt: (b, 0, 0)),     # V (per batch)
                pl.BlockSpec((1, tq, S), lambda b, qt: (b, qt, 0)),   # r_mat
                pl.BlockSpec((tq, S), lambda b, qt: (qt, 0)),         # attn_mask (int8)
                pl.BlockSpec((1, tq, S), lambda b, qt: (b, qt, 0)),   # pad_mask
            ],
            out_specs=pl.BlockSpec((1, tq, O), lambda b, qt: (b, qt, 0)),
        ),
        compiler_params=pltpu.CompilerParams(
            # K/V are precomputed, so both grid axes are independent and can be
            # megacore-sharded.
            dimension_semantics=("parallel", "parallel"),
            vmem_limit_bytes=int(vmem_limit_bytes),
        ),
    )(x, wq_t, k, v, r_mat, attn_i8, pad_mask)


def _reference(x, wq, wk, wv, r_mat, attn_mask, pad_mask):
    # Pure-JAX reference mirroring the PyTorch forward.
    scale = math.sqrt(x.shape[-1])
    q = x @ wq.T
    k = x @ wk.T
    v = x @ wv.T
    scores = (q @ jnp.swapaxes(k, -2, -1)) / scale
    r = jnp.where(pad_mask == 0.0, NEG_INF_FILL, r_mat)
    r = jnp.where(attn_mask[None, :, :] == 0.0, NEG_INF_FILL, r)
    r = jax.nn.softmax(r, axis=-1)
    scores = scores + r
    scores = jnp.where(pad_mask == 0.0, NEG_INF_FILL, scores)
    scores = jnp.where(attn_mask[None, :, :] == 0.0, NEG_INF_FILL, scores)
    prob = jax.nn.softmax(scores, axis=-1)
    return prob @ v


if __name__ == "__main__":
    B, S, F, O = 2, 8, 32, 16

    key = jax.random.PRNGKey(0)
    kx, kq, kk, kv, kr = jax.random.split(key, 5)

    x = jax.random.normal(kx, (B, S, F), dtype=jnp.float32)

    # Deterministic "Linear" weights, PyTorch shape (output_size, features).
    bound = 1.0 / math.sqrt(F)
    wq = jax.random.uniform(kq, (O, F), jnp.float32, -bound, bound)
    wk = jax.random.uniform(kk, (O, F), jnp.float32, -bound, bound)
    wv = jax.random.uniform(kv, (O, F), jnp.float32, -bound, bound)

    r_mat = jax.random.normal(kr, (B, S, S), dtype=jnp.float32)

    # Causal attention mask (S, S), float 0/1.
    attn_mask = jnp.tril(jnp.ones((S, S), dtype=jnp.float32))
    # Pad mask (B, S, S): batch 1 has its last two key positions padded out.
    pad_mask = jnp.ones((B, S, S), dtype=jnp.float32)
    pad_mask = pad_mask.at[1, :, S - 2:].set(0.0)

    out = self_attention_block(x, wq, wk, wv, r_mat, attn_mask, pad_mask)
    out = jax.block_until_ready(out)

    ref = _reference(x, wq, wk, wv, r_mat, attn_mask, pad_mask)
    assert out.shape == (B, S, O)
    assert out.dtype == x.dtype
    # Exact softmax normalization -> tight tolerance again.
    assert jnp.allclose(out, ref, atol=1e-4, rtol=1e-4), float(jnp.max(jnp.abs(out - ref)))

    print("KERNEL_OK")
</pallas_src>

<mosaic_0001>
module attributes {stable_mosaic.version = 11 : i64} {
  func.func @_self_attn_kernel(%arg0: i32, %arg1: i32, %arg2: memref<1x8x32xf32, #tpu.memory_space<vmem>>, %arg3: memref<32x16xf32, #tpu.memory_space<vmem>>, %arg4: memref<1x8x16xf32, #tpu.memory_space<vmem>>, %arg5: memref<1x8x16xf32, #tpu.memory_space<vmem>>, %arg6: memref<1x8x8xf32, #tpu.memory_space<vmem>>, %arg7: memref<8x8xi8, #tpu.memory_space<vmem>>, %arg8: memref<1x8x8xf32, #tpu.memory_space<vmem>>, %arg9: memref<1x8x16xf32, #tpu.memory_space<vmem>>) attributes {dimension_semantics = [#tpu.dimension_semantics<parallel>, #tpu.dimension_semantics<parallel>], iteration_bounds = array<i64: 2, 1>, scalar_prefetch = 0 : i64, scratch_operands = 0 : i64, tpu.core_type = #tpu.core_type<tc>, window_params = [{transform_indices = @transform_0, window_bounds = array<i64: 1, 8, 32>}, {pipeline_mode = #tpu.pipeline_mode<synchronous>, transform_indices = @transform_1, window_bounds = array<i64: 32, 16>}, {transform_indices = @transform_2, window_bounds = array<i64: 1, 8, 16>}, {transform_indices = @transform_3, window_bounds = array<i64: 1, 8, 16>}, {transform_indices = @transform_4, window_bounds = array<i64: 1, 8, 8>}, {transform_indices = @transform_5, window_bounds = array<i64: 8, 8>}, {transform_indices = @transform_6, window_bounds = array<i64: 1, 8, 8>}, {transform_indices = @transform_7, window_bounds = array<i64: 1, 8, 16>}]} {
    %c0 = arith.constant 0 : index
    %c0_0 = arith.constant 0 : index
    %c0_1 = arith.constant 0 : index
    %0 = vector.load %arg2[%c0, %c0_0, %c0_1] : memref<1x8x32xf32, #tpu.memory_space<vmem>>, vector<1x8x32xf32>
    %1 = vector.shape_cast %0 : vector<1x8x32xf32> to vector<8x32xf32>
    %c0_2 = arith.constant 0 : index
    %c0_3 = arith.constant 0 : index
    %2 = vector.load %arg3[%c0_2, %c0_3] : memref<32x16xf32, #tpu.memory_space<vmem>>, vector<32x16xf32>
    %c0_4 = arith.constant 0 : index
    %c0_5 = arith.constant 0 : index
    %c0_6 = arith.constant 0 : index
    %3 = vector.load %arg4[%c0_4, %c0_5, %c0_6] : memref<1x8x16xf32, #tpu.memory_space<vmem>>, vector<1x8x16xf32>
    %4 = vector.shape_cast %3 : vector<1x8x16xf32> to vector<8x16xf32>
    %c0_7 = arith.constant 0 : index
    %c0_8 = arith.constant 0 : index
    %c0_9 = arith.constant 0 : index
    %5 = vector.load %arg5[%c0_7, %c0_8, %c0_9] : memref<1x8x16xf32, #tpu.memory_space<vmem>>, vector<1x8x16xf32>
    %6 = vector.shape_cast %5 : vector<1x8x16xf32> to vector<8x16xf32>
    %cst = arith.constant dense<0.000000e+00> : vector<8x16xf32>
    %7 = tpu.matmul %1, %2, %cst {dimension_numbers = #tpu.dot_dimension_numbers<[1], [0], [0], [1], [0, 0, 1, 1], [], []>} : vector<8x32xf32>, vector<32x16xf32>, vector<8x16xf32> -> vector<8x16xf32>
    %cst_10 = arith.constant dense<0.000000e+00> : vector<8x8xf32>
    %8 = tpu.matmul %7, %4, %cst_10 {dimension_numbers = #tpu.dot_dimension_numbers<[1], [1], [0], [0], [0, 0, 1, 0], [], []>} : vector<8x16xf32>, vector<8x16xf32>, vector<8x8xf32> -> vector<8x8xf32>
    %c0_11 = arith.constant 0 : index
    %c0_12 = arith.constant 0 : index
    %c0_13 = arith.constant 0 : index
    %9 = vector.load %arg8[%c0_11, %c0_12, %c0_13] : memref<1x8x8xf32, #tpu.memory_space<vmem>>, vector<1x8x8xf32>
    %10 = vector.shape_cast %9 : vector<1x8x8xf32> to vector<8x8xf32>
    %cst_14 = arith.constant 0.000000e+00 : f32
    %11 = vector.broadcast %cst_14 : f32 to vector<8x8xf32>
    %12 = arith.cmpf oeq, %10, %11 : vector<8x8xf32>
    %c0_15 = arith.constant 0 : index
    %c0_16 = arith.constant 0 : index
    %13 = vector.load %arg7[%c0_15, %c0_16] : memref<8x8xi8, #tpu.memory_space<vmem>>, vector<8x8xi8>
    %14 = arith.extsi %13 : vector<8x8xi8> to vector<8x8xi32>
    %c0_i32 = arith.constant 0 : i32
    %15 = vector.broadcast %c0_i32 : i32 to vector<8x8xi32>
    %16 = arith.cmpi eq, %14, %15 : vector<8x8xi32>
    %17 = arith.ori %12, %16 : vector<8x8xi1>
    %c0_17 = arith.constant 0 : index
    %c0_18 = arith.constant 0 : index
    %c0_19 = arith.constant 0 : index
    %18 = vector.load %arg6[%c0_17, %c0_18, %c0_19] : memref<1x8x8xf32, #tpu.memory_space<vmem>>, vector<1x8x8xf32>
    %19 = vector.shape_cast %18 : vector<1x8x8xf32> to vector<8x8xf32>
    %cst_20 = arith.constant -1.000000e+09 : f32
    %20 = vector.broadcast %cst_20 : f32 to vector<8x8xf32>
    %21 = arith.select %17, %20, %19 : vector<8x8xi1>, vector<8x8xf32>
    %cst_21 = arith.constant dense<0xFF800000> : vector<8xf32>
    %22 = vector.multi_reduction <maximumf>, %21, %cst_21 [1] : vector<8x8xf32> to vector<8xf32>
    %23 = vector.shape_cast %22 : vector<8xf32> to vector<8x1xf32>
    %24 = vector.broadcast %23 : vector<8x1xf32> to vector<8x8xf32>
    %25 = arith.subf %21, %24 : vector<8x8xf32>
    %26 = math.exp %25 : vector<8x8xf32>
    %cst_22 = arith.constant dense<0.000000e+00> : vector<8xf32>
    %27 = vector.multi_reduction <add>, %26, %cst_22 [1] : vector<8x8xf32> to vector<8xf32>
    %28 = vector.shape_cast %27 : vector<8xf32> to vector<8x1xf32>
    %29 = vector.broadcast %28 : vector<8x1xf32> to vector<8x8xf32>
    %30 = arith.divf %26, %29 : vector<8x8xf32>
    %31 = arith.addf %8, %30 : vector<8x8xf32>
    %cst_23 = arith.constant -1.000000e+09 : f32
    %32 = vector.broadcast %cst_23 : f32 to vector<8x8xf32>
    %33 = arith.select %17, %32, %31 : vector<8x8xi1>, vector<8x8xf32>
    %cst_24 = arith.constant dense<0xFF800000> : vector<8xf32>
    %34 = vector.multi_reduction <maximumf>, %33, %cst_24 [1] : vector<8x8xf32> to vector<8xf32>
    %35 = vector.shape_cast %34 : vector<8xf32> to vector<8x1xf32>
    %36 = vector.broadcast %35 : vector<8x1xf32> to vector<8x8xf32>
    %37 = arith.subf %33, %36 : vector<8x8xf32>
    %38 = math.exp %37 : vector<8x8xf32>
    %cst_25 = arith.constant dense<0.000000e+00> : vector<8xf32>
    %39 = vector.multi_reduction <add>, %38, %cst_25 [1] : vector<8x8xf32> to vector<8xf32>
    %40 = vector.shape_cast %39 : vector<8xf32> to vector<8x1xf32>
    %41 = vector.broadcast %40 : vector<8x1xf32> to vector<8x8xf32>
    %42 = arith.divf %38, %41 : vector<8x8xf32>
    %cst_26 = arith.constant dense<0.000000e+00> : vector<8x16xf32>
    %43 = tpu.matmul %42, %6, %cst_26 {dimension_numbers = #tpu.dot_dimension_numbers<[1], [0], [0], [1], [0, 0, 1, 1], [], []>} : vector<8x8xf32>, vector<8x16xf32>, vector<8x16xf32> -> vector<8x16xf32>
    %c0_27 = arith.constant 0 : index
    %c0_28 = arith.constant 0 : index
    %c0_29 = arith.constant 0 : index
    %44 = vector.load %arg9[%c0_27, %c0_28, %c0_29] : memref<1x8x16xf32, #tpu.memory_space<vmem>>, vector<1x8x16xf32>
    %45 = vector.shape_cast %44 : vector<1x8x16xf32> to vector<8x16xf32>
    %46 = vector.shape_cast %43 : vector<8x16xf32> to vector<1x8x16xf32>
    tpu.vector_store %arg9[%c0_27, %c0_28, %c0_29], %46 {strides = array<i32>} : memref<1x8x16xf32, #tpu.memory_space<vmem>>, vector<1x8x16xf32>,
    return
  }
  func.func @transform_0(%arg0: i32, %arg1: i32) -> (i32, i32, i32) {
    %c0_i32 = arith.constant 0 : i32
    %c0_i32_0 = arith.constant 0 : i32
    return %arg0, %arg1, %c0_i32 : i32, i32, i32
  }
  func.func @transform_1(%arg0: i32, %arg1: i32) -> (i32, i32) {
    %c0_i32 = arith.constant 0 : i32
    %c0_i32_0 = arith.constant 0 : i32
    %c0_i32_1 = arith.constant 0 : i32
    return %c0_i32, %c0_i32_0 : i32, i32
  }
  func.func @transform_2(%arg0: i32, %arg1: i32) -> (i32, i32, i32) {
    %c0_i32 = arith.constant 0 : i32
    %c0_i32_0 = arith.constant 0 : i32
    %c0_i32_1 = arith.constant 0 : i32
    return %arg0, %c0_i32, %c0_i32_0 : i32, i32, i32
  }
  func.func @transform_3(%arg0: i32, %arg1: i32) -> (i32, i32, i32) {
    %c0_i32 = arith.constant 0 : i32
    %c0_i32_0 = arith.constant 0 : i32
    %c0_i32_1 = arith.constant 0 : i32
    return %arg0, %c0_i32, %c0_i32_0 : i32, i32, i32
  }
  func.func @transform_4(%arg0: i32, %arg1: i32) -> (i32, i32, i32) {
    %c0_i32 = arith.constant 0 : i32
    %c0_i32_0 = arith.constant 0 : i32
    return %arg0, %arg1, %c0_i32 : i32, i32, i32
  }
  func.func @transform_5(%arg0: i32, %arg1: i32) -> (i32, i32) {
    %c0_i32 = arith.constant 0 : i32
    %c0_i32_0 = arith.constant 0 : i32
    return %arg1, %c0_i32 : i32, i32
  }
  func.func @transform_6(%arg0: i32, %arg1: i32) -> (i32, i32, i32) {
    %c0_i32 = arith.constant 0 : i32
    %c0_i32_0 = arith.constant 0 : i32
    return %arg0, %arg1, %c0_i32 : i32, i32, i32
  }
  func.func @transform_7(%arg0: i32, %arg1: i32) -> (i32, i32, i32) {
    %c0_i32 = arith.constant 0 : i32
    %c0_i32_0 = arith.constant 0 : i32
    return %arg0, %arg1, %c0_i32 : i32, i32, i32
  }
}

</mosaic_0001>

<bundles_post_ra>
// kernel: tpu_custom_call.1
= control target key start
LH: loop header
LB: loop body
LE: loop exit
PB: predicated region body
PF: predicated region fallthrough
CT: control target
= control target key end

     0   :  { %s1910_s0 = inlined_call_operand.hbm [shape: f32[2,8,32], index: 0, kind: input, shape index: {}]   ;;  %s1911_s1 = inlined_call_operand.hbm [shape: f32[32,16], index: 1, kind: input, shape index: {}]   ;;  %s1912_s2 = inlined_call_operand.hbm [shape: f32[2,8,16], index: 2, kind: input, shape index: {}]   ;;  %s1913_s3 = inlined_call_operand.hbm [shape: f32[2,8,16], index: 3, kind: input, shape index: {}]   ;;  %s1914_s4 = inlined_call_operand.hbm [shape: f32[2,8,8], index: 4, kind: input, shape index: {}]   ;;  %s1915_s5 = inlined_call_operand.hbm [shape: s8[8,8], index: 5, kind: input, shape index: {}]   ;;  %s1916_s6 = inlined_call_operand.hbm [shape: f32[2,8,8], index: 6, kind: input, shape index: {}]   ;;  %s1917_s7 = inlined_call_operand.hbm [shape: f32[2,8,16], index: 7, kind: output, shape index: {}]  }
   0x1   :  { %1941 = sst [smem:[#allocation27_spill]] %s1910_s0 }
   0x2   :  { %1942 = sst [smem:[#allocation28_spill]] %s1912_s2 }
   0x3   :  { %1943 = sst [smem:[#allocation29_spill]] %s1917_s7 }
   0x4   :  { %12 = vsyncpa [#allocation3], 0 }
   0x5   :  { %14 = vsyncpa [#allocation3 + $0x1], 0 }
   0x6   :  { %15 = vsyncpa [#allocation6], 0 }
   0x7   :  { %16 = vsyncpa [#allocation12], 0 }
   0x8   :  { %18 = vsyncpa [#allocation12 + $0x1], 0 }
   0x9   :  { %19 = vsyncpa [#allocation4], 0 }
   0xa   :  { %21 = vsyncpa [#allocation4 + $0x1], 0  ;;  %s1499_s24 = smov 0   ;;  %s1501_s25 = smov 0  }
   0xb   :  { %s1503_s26 = smov 0   ;;  %s1505_s27 = smov 0  }
   0xc   :  { %s1507_s28 = smov 0   ;;  %s1509_s29 = smov 0  }
   0xd LB: > { %1944 = sst [smem:[#allocation20_spill]] %s1424_s24  ;;  %s39_s30 = sadd.s32 1, %s1440_s28  ;;  %s1444_s29 = sphi %s1509_s29, %s27_s29   ;;  %s1440_s28 = sphi %s1507_s28, %s1987_s28   ;;  %s1436_s27 = sphi %s1505_s27, %s1986_s27   ;;  %s1432_s26 = sphi %s1503_s26, %s1990_s26   ;;  %s1428_s25 = sphi %s1501_s25, %s1989_s25   ;;  %s1424_s24 = sphi %s1499_s24, %s1988_s24  }
   0xe   : > { %1945 = sst [smem:[#allocation21_spill]] %s1440_s28  ;;  %s48_s8 = sadd.s32 1, %s1432_s26 }
   0xf   : > { %1946 = sst [smem:[#allocation22_spill]] %s1444_s29  ;;  %p41_p0 = scmp.ge.s32.totalorder %s39_s30, 2 }
  0x10   : > { %p1918_p1 = scmp.ne.s32.totalorder %s1432_s26, %s1428_s25  ;;  %p56_p2 = scmp.eq.s32.totalorder %s1444_s29, 0 }
  0x11   : > { %s1992_s30 = smov (%p41_p0, %s39_s30), 0  ;;  %p1073_p5 = scmp.lt.s32.totalorder %s1444_s29, 2 }
  0x12   : > { %1947 = sst [smem:[#allocation23_spill]] %s1992_s30  ;;  %p57_p4 = por %p56_p2, %p1918_p1 }
  0x13   : > { %s43_s9 = ssub.s32 %s1440_s28, %s1992_s30  ;;  %s294_s10 = sand.u32 1, %s1444_s29  }
  0x14   : > { %p46_p6 = scmp.eq.s32.totalorder %s43_s9, 0  ;;  %s1919_s11 = sand.u32 1, %s1432_s26  }
  0x15   : > { %s1546_s12 = sshll.u32 %s1440_s28, 7  ;;  %s1553_s14 = sshll.u32 %s1919_s11, 3 }
  0x16   : > { %s1549_s13 = scalar_select %p46_p6, %s1432_s26, %s48_s8  }
  0x17   : > { %s1949_s0 = sld [smem:[#allocation27_spill]]  ;;  %p1561_p7 = pnand %p1073_p5, %p57_p4 }
  0x18   : > { %1948 = sst [smem:[#allocation24_spill]] %s1549_s13  ;;  %s298_s19 = scalar_lea.vmem [#allocation2], %s1553_s14 }
  0x19   : > { %s1950_s18 = scalar_select %p1561_p7, 1, 0 }
  0x1a   : > { %s306_s20 = sshll.u32 %s298_s19, 4  ;;  %s1568_s21 = scalar_lea.sflag [#allocation3], %s294_s10  ;;  %s1566_s20 = int_to_ptr.vmem [resolvable:$true] %s306_s20 }
  0x1b   : > { %p1574_p9 = pneg %p1561_p7 }
  0x1d   : > { %s1559_s17 = scalar_lea.hbm %s1949_s0, %s1546_s12  ;;  %s1145_s15 = scalar_lea.hbm %s1949_s0, 256 }
  0x1e   : > { %s1140_s22 = scalar_lea.hbm %s1559_s17, 128  ;;  %p1146_p12 = scmp.lt.u32.totalorder %s1559_s17, %s1949_s0 }
  0x1f   : > { %p1141_p8 = scmp.ne.s32.totalorder %s1559_s17, %s1140_s22  ;;  %p1147_p13 = scmp.lt.u32.totalorder %s1145_s15, %s1140_s22 }
  0x20   : > { %s1951_s23 = scalar_select %p1574_p9, 1, 0 }
  0x21   : > { %p1143_p10 = pnand %p1574_p9, %p1141_p8  ;;  %p1148_p0 = por %p1147_p13, %p1146_p12 }
  0x22   : > { %p1149_p2 = scmp.lt.u32.totalorder %s1140_s22, %s1559_s17 }
  0x23   : > { %p1144_p11 = pneg %p1143_p10 }
  0x24   : > { %p1150_p4 = por %p1149_p2, %p1148_p0 }
  0x26   : > { %p1151_p5 = pnand %p1150_p4, %p1144_p11 }
  0x28   : > { %1154 = shalt.err (!%p1151_p5)
}
  0x29   : > { %s1155_s10 = scalar_lea.vmem %s1566_s20, 128  ;;  %s1446_s8 = smov [#allocation2]  }
  0x2a   : > { %p1156_p6 = scmp.ne.s32.totalorder %s1566_s20, %s1155_s10  ;;  %s1160_s9 = sshll.u32 %s1446_s8, 4  ;;  %s1161_s9 = int_to_ptr.vmem [resolvable:$false] %s1160_s9 }
  0x2b   : > { %s1162_s16 = scalar_lea.vmem %s1161_s9, 256  ;;  %p1163_p3 = scmp.lt.s32.totalorder %s1566_s20, %s1161_s9 }
  0x2c   : > { %p1158_p8 = pnand %p1156_p6, %p1574_p9  ;;  %p1164_p1 = scmp.lt.s32.totalorder %s1162_s16, %s1155_s10 }
  0x2e   : > { %p1159_p10 = pneg %p1158_p8  ;;  %p1165_p12 = por %p1164_p1, %p1163_p3 }
  0x30   : > { %p1166_p13 = pnand %p1165_p12, %p1159_p10 }
  0x32   : > { %1169 = shalt.err (!%p1166_p13)
}
  0x33   : > { %1054 = dma.hbm_to_vmem [thread:$0]  (!%p1561_p7), %s1559_s17, 128, %s1566_s20, %s1568_s21  }
  0x34   : > { %s1952_s2 = sld [smem:[#allocation28_spill]]  ;;  %s317_s10 = scalar_lea.vmem [#allocation7], %s1553_s14 }
  0x35   : > { %s324_s8 = sshll.u32 %s317_s10, 4  ;;  %s325_s8 = int_to_ptr.vmem [resolvable:$true] %s324_s8 }
  0x3a   : > { %s1602_s19 = scalar_lea.hbm %s1952_s2, %s1546_s12  ;;  %s1175_s17 = scalar_lea.hbm %s1952_s2, 256 }
  0x3b   : > { %s1170_s9 = scalar_lea.hbm %s1602_s19, 128  ;;  %p1176_p0 = scmp.lt.u32.totalorder %s1602_s19, %s1952_s2 }
  0x3c   : > { %p1171_p1 = scmp.ne.s32.totalorder %s1602_s19, %s1170_s9  ;;  %p1177_p2 = scmp.lt.u32.totalorder %s1175_s17, %s1170_s9 }
  0x3d   : > { %p1179_p5 = scmp.lt.u32.totalorder %s1170_s9, %s1602_s19 }
  0x3e   : > { %p1173_p3 = pnand %p1171_p1, %p1574_p9  ;;  %p1178_p4 = por %p1177_p2, %p1176_p0 }
  0x40   : > { %p1174_p11 = pneg %p1173_p3  ;;  %p1180_p6 = por %p1179_p5, %p1178_p4 }
  0x42   : > { %p1181_p8 = pnand %p1180_p6, %p1174_p11 }
  0x44   : > { %1184 = shalt.err (!%p1181_p8)
}
  0x45   : > { %s1185_s15 = scalar_lea.vmem %s325_s8, 128  ;;  %s1447_s10 = smov [#allocation7]  }
  0x46   : > { %p1186_p10 = scmp.ne.s32.totalorder %s325_s8, %s1185_s15  ;;  %s1190_s0 = sshll.u32 %s1447_s10, 4  ;;  %s1191_s0 = int_to_ptr.vmem [resolvable:$false] %s1190_s0 }
  0x47   : > { %s1192_s11 = scalar_lea.vmem %s1191_s0, 256  ;;  %p1193_p1 = scmp.lt.s32.totalorder %s325_s8, %s1191_s0 }
  0x48   : > { %p1188_p12 = pnand %p1186_p10, %p1574_p9  ;;  %p1194_p3 = scmp.lt.s32.totalorder %s1192_s11, %s1185_s15 }
  0x4a   : > { %p1189_p13 = pneg %p1188_p12  ;;  %p1195_p7 = por %p1194_p3, %p1193_p1 }
  0x4c   : > { %p1196_p0 = pnand %p1195_p7, %p1189_p13 }
  0x4e   : > { %1199 = shalt.err (!%p1196_p0)
}
  0x4f   : > { %p1953_p2 = scmp.ne.s32.totalorder %s1950_s18, 0  ;;  %s1624_s9 = sadd.s32 4294967295, %s1444_s29  }
  0x50   : > { %s956_s0 = sadd.s32 4294967294, %s1444_s29   ;;  %p61_p7 = scmp.ne.s32.totalorder %s1428_s25, %s1424_s24 }
  0x51   : > { %1057 = dma.hbm_to_vmem [thread:$0]  (!%p1953_p2), %s1602_s19, 128, %s325_s8, %s1568_s21  }
  0x52   : > { %p1928_p11 = scmp.eq.s32.totalorder %s1624_s9, 0  ;;  %p242_p4 = scmp.eq.s32.totalorder %s1624_s9, 1 }
  0x53   : > { %p248_p5 = scmp.eq.s32.totalorder %s956_s0, 1  ;;  %p957_p6 = scmp.ge.s32.totalorder %s1444_s29, 1 }
  0x54   : > { %p1634_p8 = por %p1928_p11, %p61_p7  ;;  %p1955_p10 = scmp.ne.s32.totalorder %s1432_s26, %s1428_s25 }
  0x55   : > { %p1645_p13 = por %p248_p5, %p61_p7  ;;  %p255_p1 = scmp.lt.s32.totalorder %s1444_s29, 3 }
  0x56   : > { %s1954_s16 = scalar_select %p1634_p8, 1, 0 }
  0x57   : > { %p1641_p12 = por %p242_p4, %p1955_p10  ;;  %p1650_p3 = pnand %p957_p6, %p255_p1 }
  0x58   : > { %s1958_s8 = scalar_select %p1645_p13, 1, 0 }
  0x59   : > { %s1956_s19 = scalar_select %p1641_p12, 1, 0 }
  0x5a   : > { %1959 = sst [smem:[#allocation26_spill]] %s1958_s8  ;;  %s1448_s20 = smov [#allocation5]  }
  0x5b   : > { %1957 = sst [smem:[#allocation25_spill]] %s1956_s19  ;;  %s267_s22 = sshll.u32 %s1448_s20, 4  ;;  %s1654_s22 = int_to_ptr.vmem [resolvable:$true] %s267_s22 }
  0x5c   : > { %s1960_s17 = scalar_select %p1650_p3, 1, 0 }
  0x5d   : > { %p1044_p0 = pneg %p1650_p3  ;;  %s1662_s11 = scalar_lea.hbm %s1913_s3, %s1546_s12 }
  0x5e   : > { %s335_s2 = scalar_lea.vmem [#allocation8], %s1553_s14  ;;  %s1449_s20 = smov [#allocation10]  }
  0x5f   : > { %p1666_p7 = pnand %p1044_p0, %p1928_p11  ;;  %s342_s30 = sshll.u32 %s335_s2, 4  ;;  %s1671_s30 = int_to_ptr.vmem [resolvable:$true] %s342_s30 }
  0x60   : > { %s1673_s28 = sshll.u32 %s1449_s20, 4  ;;  %s1200_s15 = scalar_lea.hbm %s1911_s1, 512  ;;  %s284_s28 = int_to_ptr.vmem [resolvable:$true] %s1673_s28 }
  0x61   : > { %s1961_s0 = scalar_select %p1666_p7, 1, 0 }
  0x62   : > { %p1201_p4 = scmp.ne.s32.totalorder %s1911_s1, %s1200_s15  ;;  %p1935_p5 = pneg %p1666_p7 }
  0x63   : > { %p1207_p1 = scmp.lt.u32.totalorder %s1200_s15, %s1911_s1 }
  0x64   : > { %p1203_p6 = pnand %p1935_p5, %p1201_p4 }
  0x66   : > { %p1204_p10 = pneg %p1203_p6 }
  0x68   : > { %p1209_p0 = pnand %p1207_p1, %p1204_p10 }
  0x6a   : > { %1212 = shalt.err (!%p1209_p0)
}
  0x6b   : > { %s1213_s29 = scalar_lea.vmem %s1654_s22, 512  ;;  %p1221_p8 = scmp.lt.s32.totalorder %s1654_s22, %s1654_s22 }
  0x6c   : > { %p1214_p11 = scmp.ne.s32.totalorder %s1654_s22, %s1213_s29  ;;  %p1222_p4 = scmp.lt.s32.totalorder %s1213_s29, %s1213_s29 }
  0x6e   : > { %p1216_p13 = pnand %p1214_p11, %p1935_p5  ;;  %p1223_p6 = por %p1222_p4, %p1221_p8 }
  0x70   : > { %p1217_p12 = pneg %p1216_p13 }
  0x72   : > { %p1224_p3 = pnand %p1223_p6, %p1217_p12 }
  0x74   : > { %1227 = shalt.err (!%p1224_p3)
}
  0x75   : > { %s1450_s24 = smov 128   ;;  %s1451_s13 = smov 8  }
  0x76   : > { %1047 = dma.hbm_to_vmem [thread:$0]  (!%p1666_p7), %s1911_s1, 512, %s1654_s22, [#allocation6], %s1450_s24, %s1450_s24, %s1451_s13  }
  0x77   : > { %s1228_s15 = scalar_lea.hbm %s1662_s11, 128  ;;  %s1233_s29 = scalar_lea.hbm %s1913_s3, 256 }
  0x78   : > { %p1229_p11 = scmp.ne.s32.totalorder %s1662_s11, %s1228_s15  ;;  %p1234_p13 = scmp.lt.u32.totalorder %s1662_s11, %s1913_s3 }
  0x79   : > { %p1235_p3 = scmp.lt.u32.totalorder %s1233_s29, %s1228_s15  ;;  %p1237_p1 = scmp.lt.u32.totalorder %s1228_s15, %s1662_s11 }
  0x7a   : > { %p1231_p8 = pnand %p1229_p11, %p1574_p9 }
  0x7b   : > { %p1236_p10 = por %p1235_p3, %p1234_p13 }
  0x7c   : > { %p1232_p12 = pneg %p1231_p8 }
  0x7d   : > { %p1238_p0 = por %p1237_p1, %p1236_p10 }
  0x7f   : > { %p1239_p4 = pnand %p1238_p0, %p1232_p12 }
  0x81   : > { %1242 = shalt.err (!%p1239_p4)
}
  0x82   : > { %s1243_s22 = scalar_lea.vmem %s1671_s30, 128  ;;  %s1452_s24 = smov [#allocation8]  }
  0x83   : > { %p1244_p6 = scmp.ne.s32.totalorder %s1671_s30, %s1243_s22  ;;  %s1248_s13 = sshll.u32 %s1452_s24, 4  ;;  %s1249_s13 = int_to_ptr.vmem [resolvable:$false] %s1248_s13 }
  0x84   : > { %s1250_s7 = scalar_lea.vmem %s1249_s13, 256  ;;  %p1251_p5 = scmp.lt.s32.totalorder %s1671_s30, %s1249_s13 }
  0x85   : > { %p1246_p11 = pnand %p1244_p6, %p1574_p9  ;;  %p1252_p7 = scmp.lt.s32.totalorder %s1250_s7, %s1243_s22 }
  0x87   : > { %p1247_p8 = pneg %p1246_p11  ;;  %p1253_p13 = por %p1252_p7, %p1251_p5 }
  0x89   : > { %p1254_p3 = pnand %p1253_p13, %p1247_p8 }
  0x8b   : > { %1257 = shalt.err (!%p1254_p3)
}
  0x8c   : > { %1060 = dma.hbm_to_vmem [thread:$0]  (!%p1953_p2), %s1662_s11, 128, %s1671_s30, %s1568_s21  }
  0x8d   : > { %s1258_s20 = scalar_lea.hbm %s1915_s5, 32  ;;  %p1962_p7 = scmp.ne.s32.totalorder %s1961_s0, 0 }
  0x8e   : > { %p1259_p12 = scmp.ne.s32.totalorder %s1915_s5, %s1258_s20  ;;  %p1265_p0 = scmp.lt.u32.totalorder %s1258_s20, %s1915_s5 }
  0x8f   : > { %p1963_p5 = pneg %p1962_p7 }
  0x91   : > { %p1261_p10 = pnand %p1259_p12, %p1963_p5 }
  0x93   : > { %p1262_p1 = pneg %p1261_p10 }
  0x95   : > { %p1267_p4 = pnand %p1265_p0, %p1262_p1 }
  0x97   : > { %1270 = shalt.err (!%p1267_p4)
}
  0x98   : > { %s1271_s30 = scalar_lea.vmem %s284_s28, 32  ;;  %p1964_p11 = pmov %p1963_p5 }
  0x99   : > { %p1272_p6 = scmp.ne.s32.totalorder %s284_s28, %s1271_s30  ;;  %p1279_p3 = scmp.lt.s32.totalorder %s284_s28, %s284_s28 }
  0x9a   : > { %p1280_p2 = scmp.lt.s32.totalorder %s1271_s30, %s1271_s30 }
  0x9b   : > { %p1274_p8 = pnand %p1272_p6, %p1964_p11 }
  0x9c   : > { %p1281_p9 = por %p1280_p2, %p1279_p3 }
  0x9d   : > { %p1275_p13 = pneg %p1274_p8 }
  0x9f   : > { %p1282_p5 = pnand %p1281_p9, %p1275_p13 }
  0xa1   : > { %1285 = shalt.err (!%p1282_p5)
}
  0xa2   : > { %1050 = dma.hbm_to_vmem [thread:$0]  (!%p1962_p7), %s1915_s5, 32, %s284_s28, [#allocation6]  }
  0xa3   : > { %s1749_s7 = scalar_lea.hbm %s1914_s4, %s1546_s12  ;;  %s353_s19 = scalar_lea.vmem [#allocation9], %s1553_s14 }
  0xa4   : > { %s361_s8 = sshll.u32 %s353_s19, 4  ;;  %s1286_s0 = scalar_lea.hbm %s1749_s7, 128  ;;  %s362_s8 = int_to_ptr.vmem [resolvable:$true] %s361_s8 }
  0xa5   : > { %p1287_p9 = scmp.ne.s32.totalorder %s1749_s7, %s1286_s0  ;;  %p1965_p2 = scmp.ne.s32.totalorder %s1951_s23, 0 }
  0xa6   : > { %s1291_s28 = scalar_lea.hbm %s1914_s4, 256  ;;  %p1292_p7 = scmp.lt.u32.totalorder %s1749_s7, %s1914_s4 }
  0xa7   : > { %p1289_p12 = pnand %p1287_p9, %p1965_p2  ;;  %p1293_p1 = scmp.lt.u32.totalorder %s1291_s28, %s1286_s0 }
  0xa8   : > { %p1295_p4 = scmp.lt.u32.totalorder %s1286_s0, %s1749_s7 }
  0xa9   : > { %p1290_p10 = pneg %p1289_p12  ;;  %p1294_p0 = por %p1293_p1, %p1292_p7 }
  0xab   : > { %p1296_p6 = por %p1295_p4, %p1294_p0 }
  0xad   : > { %p1297_p11 = pnand %p1296_p6, %p1290_p10 }
  0xaf   : > { %1300 = shalt.err (!%p1297_p11)
}
  0xb0   : > { %s1301_s29 = scalar_lea.vmem %s362_s8, 128  ;;  %s1453_s30 = smov [#allocation9]  }
  0xb1   : > { %p1302_p8 = scmp.ne.s32.totalorder %s362_s8, %s1301_s29  ;;  %s1306_s11 = sshll.u32 %s1453_s30, 4  ;;  %s1307_s11 = int_to_ptr.vmem [resolvable:$false] %s1306_s11 }
  0xb2   : > { %s1308_s22 = scalar_lea.vmem %s1307_s11, 256  ;;  %p1309_p5 = scmp.lt.s32.totalorder %s362_s8, %s1307_s11 }
  0xb3   : > { %p1304_p13 = pnand %p1302_p8, %p1965_p2  ;;  %p1310_p9 = scmp.lt.s32.totalorder %s1308_s22, %s1301_s29 }
  0xb5   : > { %p1305_p3 = pneg %p1304_p13  ;;  %p1311_p12 = por %p1310_p9, %p1309_p5 }
  0xb7   : > { %p1312_p1 = pnand %p1311_p12, %p1305_p3 }
  0xb9   : > { %1315 = shalt.err (!%p1312_p1)
}
  0xba   : > { %p1966_p7 = scmp.ne.s32.totalorder %s1950_s18, 0  ;;  %s1774_s19 = scalar_lea.hbm %s1916_s6, %s1546_s12 }
  0xbb   : > { %s372_s0 = scalar_lea.vmem [#allocation11], %s1553_s14  ;;  %s1967_s15 = sand.u32 1, %s1432_s26  }
  0xbc   : > { %1063 = dma.hbm_to_vmem [thread:$0]  (!%p1966_p7), %s1749_s7, 128, %s362_s8, %s1568_s21  }
  0xbd   : > { %s380_s20 = sshll.u32 %s372_s0, 4  ;;  %s369_s28 = scalar_lea.sflag [#allocation12], %s1967_s15  ;;  %s381_s20 = int_to_ptr.vmem [resolvable:$true] %s380_s20 }
  0xbe   : > { %s1316_s10 = scalar_lea.hbm %s1774_s19, 128  ;;  %s1321_s8 = scalar_lea.hbm %s1916_s6, 256 }
  0xbf   : > { %p1317_p10 = scmp.ne.s32.totalorder %s1774_s19, %s1316_s10  ;;  %p1322_p6 = scmp.lt.u32.totalorder %s1774_s19, %s1916_s6 }
  0xc0   : > { %p1323_p11 = scmp.lt.u32.totalorder %s1321_s8, %s1316_s10  ;;  %p1325_p13 = scmp.lt.u32.totalorder %s1316_s10, %s1774_s19 }
  0xc1   : > { %p1319_p0 = pnand %p1317_p10, %p1965_p2 }
  0xc2   : > { %p1324_p8 = por %p1323_p11, %p1322_p6 }
  0xc3   : > { %p1320_p4 = pneg %p1319_p0 }
  0xc4   : > { %p1326_p3 = por %p1325_p13, %p1324_p8 }
  0xc6   : > { %p1327_p5 = pnand %p1326_p3, %p1320_p4 }
  0xc8   : > { %1330 = shalt.err (!%p1327_p5)
}
  0xc9   : > { %s1331_s14 = scalar_lea.vmem %s381_s20, 128  ;;  %s1454_s29 = smov [#allocation11]  }
  0xca   : > { %p1332_p9 = scmp.ne.s32.totalorder %s381_s20, %s1331_s14  ;;  %s1336_s30 = sshll.u32 %s1454_s29, 4  ;;  %s1337_s30 = int_to_ptr.vmem [resolvable:$false] %s1336_s30 }
  0xcb   : > { %s1338_s11 = scalar_lea.vmem %s1337_s30, 256  ;;  %p1339_p10 = scmp.lt.s32.totalorder %s381_s20, %s1337_s30 }
  0xcc   : > { %p1334_p12 = pnand %p1332_p9, %p1965_p2  ;;  %p1340_p0 = scmp.lt.s32.totalorder %s1338_s11, %s1331_s14 }
  0xce   : > { %p1335_p1 = pneg %p1334_p12  ;;  %p1341_p7 = por %p1340_p0, %p1339_p10 }
  0xd0   : > { %p1342_p6 = pnand %p1341_p7, %p1335_p1 }
  0xd2   : > { %1345 = shalt.err (!%p1342_p6)
}
  0xd3   : > { %p1968_p11 = scmp.ne.s32.totalorder %s1950_s18, 0  ;;  %p1969_p4 = scmp.ne.s32.totalorder %s1960_s17, 0 }
  0xd4   : > { %s391_s23 = sand.u32 (!%p1969_p4), 1, %s1624_s9   ;;  %s1800_s22 = sand.u32 (!%p1969_p4), 1, %s1428_s25  }
  0xd5   : > { %1066 = dma.hbm_to_vmem [thread:$0]  (!%p1968_p11), %s1774_s19, 128, %s381_s20, %s369_s28  }
  0xd6   : > { %389 = sbr.rel (%p1969_p4) target bundleno = 1211 (0x4bb), region = 48  ;;  %s1803_s24 = sshll.u32 (!%p1969_p4), %s1800_s22, 3 }
  0xd7   : > { %s392_s13 = scalar_lea.sflag (!%p1969_p4), [#allocation3], %s391_s23  ;;  %s395_s0 = scalar_lea.vmem (!%p1969_p4), [#allocation2], %s1803_s24 }
  0xd8   : > { %p1970_p2 = scmp.ne.s32.totalorder (!%p1969_p4), %s1954_s16, 0 }
  0xdd   : > { %1399 = dma.done.wait (%p1970_p2), %s392_s13, 128  }
  0xde   : > { %1401 = vsyncadd (%p1970_p2), %s392_s13, 4294967168  ;;  %p1971_p7 = scmp.eq.s32.totalorder %s1624_s9, 0 }
  0xe0   : > { %1403 = dma.done.wait (%p1971_p7), [#allocation6], 512   ;;  %p1972_p8 = pmov %p1971_p7 }
  0xe1   : > { %s408_s18 = scalar_lea.vmem [#allocation7], %s1803_s24 }
  0xe2   : > { %1405 = vsyncadd (%p1972_p8), [#allocation6], 4294966784 }
  0xe3   : > { %1407 = dma.done.wait (%p1970_p2), %s392_s13, 384  }
  0xe4   : > { %1409 = vsyncadd (%p1970_p2), %s392_s13, 4294966912  ;;  %s417_s17 = scalar_lea.vmem [#allocation8], %s1803_s24  ;;  %s426_s19 = scalar_lea.vmem [#allocation9], %s1803_s24 }
  0xe5   : > { %p1973_p13 = pmov %p1971_p7 }
  0xe6   : > { %p1974_p3 = pmov %p1971_p7 }
  0xe7   : > { %1411 = dma.done.wait (%p1973_p13), [#allocation6], 32  }
  0xe8   : > { %1413 = vsyncadd (%p1974_p3), [#allocation6], 4294967264  ;;  %s436_s20 = scalar_lea.sflag [#allocation12], %s1800_s22  ;;  %s439_s15 = scalar_lea.vmem [#allocation11], %s1803_s24 }
  0xe9   : > { %1415 = dma.done.wait (%p1970_p2), %s436_s20, 128  }
  0xea   : > { %1417 = vsyncadd (%p1970_p2), %s436_s20, 4294967168  ;;  %v1455_v0 = vmov 0.0|0.0   ;;  %vm1456_vm0 = vmmov 0   ;;  %v1457_v1 = vmov 0.0   ;;  %v491_v2 = vld [vmem:[#allocation5] sm:$0xff]  ;;  %v492_v3 = vld [vmem:[#allocation5 + $0x8] sm:$0xff] }
  0xeb   : > { %1018 = vmatprep.subr.bf16.mxu0 %v1455_v0  ;;  %1005 = vmatprep.mubr.msk.f32.mxu0 %vm1456_vm0, %v1457_v1  ;;  %v571_v4 = vld [vmem:[%s439_s15] sm:$0xff]  ;;  %v1019_v5 = vpack.c.bf16 %v492_v3, %v491_v2  ;;  %v573_v6 = vld [vmem:[#allocation10] sm:$0x3]  ;;  %v577_v10 = vld [vmem:[%s426_s19] sm:$0xff]  ;;  %vm579_vm3 = vcmask 64512   ;;  %vm497_vm5 = vcmask 261120  }
  0xec   : > { %1008 = vmatprep.subr.mxu1 %v1457_v1  ;;  %1010 = vmatprep.mubr.msk.f32.mxu1 %vm1456_vm0, %v1457_v1  ;;  %v493_v7 = vld [vmem:[#allocation5 + $0x10] sm:$0xff]  ;;  %vm572_vm1 = vcmp.eq.f32.partialorder %v571_v4, 0.0  ;;  %v574_v8 = vunpack.c.0.s8 %v573_v6  ;;  %v494_v9 = vld [vmem:[#allocation5 + $0x18] sm:$0xff]  ;;  %v495_v16 = vld [vmem:[%s408_s18] sm:$0xff]  ;;  %vm591_vm6 = vcmask 130048   ;;  %s1977_s9 = sld [smem:[#allocation25_spill]] }
  0xed   : > { %1020 = vmatpush3.bf16.msra.mxu0 %v1019_v5  ;;  %v1022_v11 = vpack.c.bf16 %v494_v9, %v493_v7  ;;  %v490_v15 = vld [vmem:[%s395_s0] sm:$0xff]  ;;  %1009 = vmatpush3.xpose.msk.msra.mxu1 %vm591_vm6, %v495_v16  ;;  %s985_s16 = sshll.u32 %s1436_s27, 7  ;;  %s489_s28 = scalar_lea.vmem [#allocation13], %s1803_s24 }
  0xee   : > { %1021 = vmatprep.subr.bf16.mxu0 %v1455_v0  ;;  %vm575_vm2 = vcmp.eq.s32.totalorder %v574_v8, 0  ;;  %1013 = vmatprep.subr.mxu1 %v1457_v1  ;;  %v496_v37 = vld [vmem:[%s417_s17] sm:$0xff]  ;;  %s769_s10 = sshll.u32 %s489_s28, 4  ;;  %s1978_s8 = sld [smem:[#allocation29_spill]]  ;;  %s1862_s10 = int_to_ptr.vmem [resolvable:$true] %s769_s10 }
  0xef   : > { %vm1833_vm4 = vmor %vm572_vm1, %vm575_vm2  ;;  %s755_s2 = scalar_lea.sflag [#allocation4], %s1800_s22  ;;  %s1346_s14 = scalar_lea.vmem %s1862_s10, 128 }
  0xf0   : > { %v578_v13 = vsel %vm1833_vm4, -1e+09, %v577_v10  ;;  %p1347_p5 = scmp.ne.s32.totalorder %s1862_s10, %s1346_s14  ;;  %s1458_s27 = smov [#allocation13]  }
  0xf1   : > { %v580_v14 = vsel %vm579_vm3, %v578_v13, -inf  ;;  %1023 = vmatpush3.bf16.msra.mxu0 %v1022_v11  ;;  %s1350_s29 = sshll.u32 %s1458_s27, 4  ;;  %s1351_s29 = int_to_ptr.vmem [resolvable:$false] %s1350_s29 }
  0xf2   : > { %581 = vmax.xlane.f32.xlu0 %v580_v14  ;;  %p1979_p9 = scmp.ne.s32.totalorder %s1977_s9, 0  ;;  %s1352_s30 = scalar_lea.vmem %s1351_s29, 256 }
  0xf3   : > { %p1353_p10 = scmp.lt.s32.totalorder %s1862_s10, %s1351_s29  ;;  %p1354_p0 = scmp.lt.s32.totalorder %s1352_s30, %s1346_s14 }
  0xf4   : > { %1006 = vmatmul.mubr.msk.f32.vlgmr.msra.gmra.mrb[0].mxu0 %vm497_vm5, %v490_v15  ;;  %s1860_s12 = scalar_lea.hbm %s1978_s8, %s985_s16  ;;  %p1348_p12 = pnand %p1347_p5, %p1979_p9 }
  0xf5   : > { %p1355_p6 = por %p1354_p0, %p1353_p10 }
  0xf6   : > { %p1349_p1 = pneg %p1348_p12 }
  0xf8   : > { %p1356_p11 = pnand %p1355_p6, %p1349_p1 }
 0x17f   : > { %v582_v17 = vpop.xlane.xlu0 %581 }
 0x180   : > { %v583_v18 = vsub.f32 %v578_v13, %v582_v17 }
 0x182   : > { %v584_v19 = vmul.f32 1.442695, %v583_v18 }
 0x184   : > { %1132 = vpow2.f32 %v584_v19 }
 0x18e   : > { %v1133_v20 = vpop.eup %1132 }
 0x18f   : > { %v586_v21 = vsel %vm579_vm3, %v1133_v20, 0.0 }
 0x190   : > { %587 = vadd.xlane.f32.xlu0 %v586_v21 }
 0x1c7   : > { %v567_v22 = vpop.f32.mrb[0].mxu0 }
 0x1c8   : > { %v1007_v23 = vpop.f32.mrb[1].mxu0  ;;  %1011 = vmatmul.mubr.msk.f32.vlgmr.msra.gmra.mrb[0].mxu1 %vm591_vm6, %v567_v22 }
 0x1c9   : > { %1015 = vmatprep.mubr.msk.f32.mxu1 %vm1456_vm0, %v1457_v1  ;;  %1014 = vmatpush3.msra.mxu1 %v496_v37 }
 0x21d   : > { %v588_v24 = vpop.xlane.xlu0 %587 }
 0x21e   : > { %1134 = vrcp.f32 %v588_v24 }
 0x228   : > { %v1135_v25 = vpop.eup %1134 }
 0x229   : > { %v590_v26 = vmul.f32 %v1135_v25, %v1133_v20 }
 0x29b   : > { %v664_v27 = vpop.f32.mrb[0].mxu1 }
 0x29c   : > { %v665_v28 = vadd.f32 %v664_v27, %v590_v26  ;;  %v1012_v29 = vpop.f32.mrb[1].mxu1 }
 0x29e   : > { %v668_v30 = vsel %vm1833_vm4, -1e+09, %v665_v28 }
 0x29f   : > { %v669_v31 = vsel %vm579_vm3, %v668_v30, -inf }
 0x2a0   : > { %670 = vmax.xlane.f32.xlu1 %v669_v31 }
 0x32d   : > { %v671_v32 = vpop.xlane.xlu1 %670 }
 0x32e   : > { %v672_v33 = vsub.f32 %v668_v30, %v671_v32 }
 0x330   : > { %v673_v34 = vmul.f32 1.442695, %v672_v33 }
 0x332   : > { %1136 = vpow2.f32 %v673_v34 }
 0x33c   : > { %v1137_v35 = vpop.eup %1136 }
 0x33d   : > { %v675_v36 = vsel %vm579_vm3, %v1137_v35, 0.0 }
 0x33e   : > { %676 = vadd.xlane.f32.xlu1 %v675_v36 }
 0x3cb   : > { %v677_v38 = vpop.xlane.xlu1 %676 }
 0x3cc   : > { %1138 = vrcp.f32 %v677_v38 }
 0x3d6   : > { %v1139_v39 = vpop.eup %1138 }
 0x3d7   : > { %v679_v40 = vmul.f32 %v1139_v39, %v1137_v35 }
 0x3d9   : > { %1016 = vmatmul.mubr.msk.f32.vlgmr.msra.gmra.mrb[2].mxu1 %vm579_vm3, %v679_v40 }
 0x4ac   : > { %v749_v41 = vpop.f32.mrb[2].mxu1 }
 0x4ad   : > { %753 = vst.msk [vmem:[%s489_s28] sm:$0xff] %vm591_vm6, %v749_v41  ;;  %v1017_v42 = vpop.f32.mrb[3].mxu1 }
 0x4ae   : > { %1359 = shalt.err (!%p1356_p11)
}
 0x4af   : > { %s1360_s11 = scalar_lea.hbm %s1860_s12, 128  ;;  %s1364_s24 = scalar_lea.hbm %s1978_s8, 256 }
 0x4b0   : > { %p1361_p4 = scmp.ne.s32.totalorder %s1860_s12, %s1360_s11  ;;  %p1365_p8 = scmp.lt.u32.totalorder %s1860_s12, %s1978_s8 }
 0x4b1   : > { %p1366_p13 = scmp.lt.u32.totalorder %s1364_s24, %s1360_s11  ;;  %p1368_p5 = scmp.lt.u32.totalorder %s1360_s11, %s1860_s12 }
 0x4b2   : > { %p1362_p2 = pnand %p1361_p4, %p1979_p9 }
 0x4b3   : > { %p1367_p3 = por %p1366_p13, %p1365_p8 }
 0x4b4   : > { %p1363_p7 = pneg %p1362_p2 }
 0x4b5   : > { %p1369_p12 = por %p1368_p5, %p1367_p3 }
 0x4b7   : > { %p1370_p1 = pnand %p1369_p12, %p1363_p7 }
 0x4b9   : > { %1373 = shalt.err (!%p1370_p1)
}
 0x4ba   : > { %1042 = dma.vmem_to_hbm [thread:$0]  (%p1979_p9), %s1862_s10, 128, %s1860_s12, %s755_s2  }
 0x4bb PF: > { %s1980_s18 = sld [smem:[#allocation20_spill]]  ;;  %s1981_s17 = sld [smem:[#allocation26_spill]] }
 0x4bc   : > { %s1982_s19 = sld [smem:[#allocation22_spill]] }
 0x4c1   : > { %s781_s20 = sand.u32 1, %s1980_s18   ;;  %p1983_p10 = scmp.ne.s32.totalorder %s1981_s17, 0 }
 0x4c2   : > { %p1984_p0 = scmp.ge.s32.totalorder %s1982_s19, 2  ;;  %s782_s15 = scalar_lea.sflag [#allocation4], %s781_s20 }
 0x4c4   : > { %p1068_p6 = pnand %p1984_p0, %p1983_p10 }
 0x4c6   : > { %1419 = dma.done.wait (!%p1068_p6), %s782_s15, 128  }
 0x4c7   : > { %1421 = vsyncadd (!%p1068_p6), %s782_s15, 4294967168  ;;  %s27_s29 = sadd.s32 1, %s1982_s19   ;;  %s1985_s9 = sld [smem:[#allocation24_spill]] }
 0x4c8   : > { %p24_p11 = scmp.ge.s32.totalorder %s27_s29, 4   ;;  %s1986_s27 = sld [smem:[#allocation21_spill]] }
 0x4c9   : > { %s1987_s28 = sld [smem:[#allocation23_spill]]  ;;  %s1988_s24 = smov %s1428_s25 }
 0x4ca   : > { %s1989_s25 = smov %s1432_s26  ;;  %26 = sbr.rel (!%p24_p11) target bundleno = 13 (0xd), region = 148 }
 0x4cd   : > { %s1990_s26 = smov %s1985_s9 }
 0x4d1   :  { %787 = vsyncpa [#allocation3], 1 }
 0x4d2   :  { %789 = vsyncpa [#allocation3 + $0x1], 1 }
 0x4d3   :  { %790 = vsyncpa [#allocation6], 1 }
 0x4d4   :  { %791 = vsyncpa [#allocation12], 1 }
 0x4d5   :  { %793 = vsyncpa [#allocation12 + $0x1], 1 }
 0x4d6   :  { %794 = vsyncpa [#allocation4], 1 }
 0x4d7   :  { %796 = vsyncpa [#allocation4 + $0x1], 1 }

</bundles_post_ra>
